<compile_context>
chip_gen: v5e
topology: v5e:2x2
jax: 0.10.0
libtpu: 0.0.40
codegen_flags: <defaults>
</compile_context>

<pallas_src>
import math

import jax
import jax.numpy as jnp
from jax.experimental import pallas as pl
from jax.experimental.pallas import tpu as pltpu


def _round_up(x, m):
    return ((x + m - 1) // m) * m


def _vmem_limit_bytes(needed):
    """Footprint-derived VMEM limit, capped at ~85% of per-core capacity."""
    try:
        cap = pltpu.get_tpu_info().vmem_capacity_bytes
    except Exception:  # query unavailable (e.g. interpret mode)
        cap = 64 << 20  # conservative per-TC fallback (v7x)
    cap = int(cap * 0.85)
    return int(min(max(needed + (4 << 20), 32 << 20), cap))


def aggregate_kernel(adj_ref, s_ref, o_ref, acc_ref):
    """Output row tile = relu( sum_k adj[i, k] @ support[k] )."""
    k = pl.program_id(1)

    @pl.when(k == 0)
    def _():
        acc_ref[...] = jnp.zeros_like(acc_ref)

    # adj arrives in its stored dtype (f32); cast in-vreg for the MXU dot.
    adj_tile = adj_ref[...].astype(s_ref.dtype)
    acc_ref[...] += jnp.dot(
        adj_tile, s_ref[...], preferred_element_type=jnp.float32
    )

    @pl.when(k == pl.num_programs(1) - 1)
    def _():
        o_ref[...] = jnp.maximum(acc_ref[...], 0.0).astype(o_ref.dtype)


def gcn_embed(x, adj, w, *, tm=512, tk=512, compute_dtype=jnp.bfloat16):
    """relu(adj @ (x @ w)) -- GCNEmbedder / GraphConvolution forward (eval)."""
    n, f_in = x.shape
    f_in2, h = w.shape
    assert f_in == f_in2 and adj.shape == (n, n)

    # Lane-dense tiling: hidden dim and both node tile sizes are 128 multiples.
    h_pad = _round_up(max(h, 1), 128)
    n128 = _round_up(n, 128)
    tm = min(_round_up(max(tm, 128), 128), n128)
    tk = min(_round_up(max(tk, 128), 128), n128)
    n_pad = _round_up(n, math.lcm(tm, tk))
    grid = (n_pad // tm, n_pad // tk)

    # support = x @ W: tiny, computed by XLA in f32, cast to bf16 once
    # (it is re-read n_pad // tm times by the aggregation kernel).
    support = jnp.dot(x, w).astype(compute_dtype)
    if (n_pad, h_pad) != (n, h):
        support = (
            jnp.zeros((n_pad, h_pad), compute_dtype).at[:n, :h].set(support)
        )

    # adj stays in its stored dtype -- no wrapper-side bf16 copy of the N^2
    # stream; pad with zeros only when the node dim is not tile-aligned
    # (padded columns must be zero so the contraction stays exact).
    if n_pad != n:
        adj_in = jnp.zeros((n_pad, n_pad), adj.dtype).at[:n, :n].set(adj)
    else:
        adj_in = adj

    adj_isz = jnp.dtype(adj_in.dtype).itemsize
    sup_isz = jnp.dtype(compute_dtype).itemsize
    vmem_needed = (
        2 * tm * tk * adj_isz        # adj tile, double-buffered
        + 2 * tk * h_pad * sup_isz   # support tile, double-buffered
        + 2 * tm * h_pad * 4         # f32 output tile, double-buffered
        + tm * h_pad * 4             # f32 accumulator scratch
    )

    out_pad = pl.pallas_call(
        aggregate_kernel,
        out_shape=jax.ShapeDtypeStruct((n_pad, h_pad), jnp.float32),
        grid_spec=pltpu.PrefetchScalarGridSpec(
            num_scalar_prefetch=0,
            grid=grid,
            in_specs=[
                pl.BlockSpec((tm, tk), lambda i, k: (i, k)),
                pl.BlockSpec((tk, h_pad), lambda i, k: (k, 0)),
            ],
            out_specs=pl.BlockSpec((tm, h_pad), lambda i, k: (i, 0)),
            scratch_shapes=[pltpu.VMEM((tm, h_pad), jnp.float32)],
        ),
        compiler_params=pltpu.CompilerParams(
            dimension_semantics=("parallel", "arbitrary"),
            vmem_limit_bytes=_vmem_limit_bytes(vmem_needed),
        ),
        cost_estimate=pl.CostEstimate(
            flops=2 * n_pad * n_pad * h_pad,
            transcendentals=0,
            bytes_accessed=(
                adj_isz * n_pad * n_pad
                + sup_isz * (n_pad // tm) * n_pad * h_pad
                + 4 * n_pad * h_pad
            ),
        ),
    )(adj_in, support)

    # Slice off node/hidden padding.
    return out_pad[:n, :h]


def reference(x, adj, w):
    return jnp.maximum(adj @ (x @ w), 0.0)


if __name__ == "__main__":
    # Small but grid-exercising shapes: 256 nodes, 64 input feats, hidden 32
    # (hidden padded to 128 inside the kernel; tm=tk=128 -> 2x2 grid, so both
    # the row-parallel axis and the k-accumulation axis are exercised).
    N, INPUT_FEAT_DIM, HIDDEN_DIM1 = 256, 64, 32
    key = jax.random.PRNGKey(0)
    kx, kadj, kw = jax.random.split(key, 3)

    # Node features.
    x = jax.random.normal(kx, (N, INPUT_FEAT_DIM), dtype=jnp.float32)

    # Symmetric, row-normalized adjacency with self-loops (deterministic).
    a = (jax.random.uniform(kadj, (N, N)) > 0.7).astype(jnp.float32)
    a = jnp.maximum(a, a.T) + jnp.eye(N, dtype=jnp.float32)
    deg = jnp.sum(a, axis=1, keepdims=True)
    adj = a / deg

    # Glorot-uniform weights (matches GraphConvolution.reset_parameters shape-wise).
    limit = (6.0 / (INPUT_FEAT_DIM + HIDDEN_DIM1)) ** 0.5
    w = jax.random.uniform(
        kw, (INPUT_FEAT_DIM, HIDDEN_DIM1), minval=-limit, maxval=limit,
        dtype=jnp.float32,
    )

    out = jax.block_until_ready(gcn_embed(x, adj, w, tm=128, tk=128))
    ref = reference(x, adj, w)

    assert out.shape == (N, HIDDEN_DIM1)
    # bf16 MXU operands + f32 accumulation vs f32 reference -> loosened tolerance.
    assert jnp.allclose(out, ref, atol=5e-2, rtol=5e-2), float(
        jnp.max(jnp.abs(out - ref))
    )
    print("KERNEL_OK")
</pallas_src>

<mosaic_0001>
module attributes {stable_mosaic.version = 11 : i64} {
  func.func @aggregate_kernel(%arg0: i32, %arg1: i32, %arg2: memref<128x128xf32, #tpu.memory_space<vmem>>, %arg3: memref<128x128xbf16, #tpu.memory_space<vmem>>, %arg4: memref<128x128xf32, #tpu.memory_space<vmem>>, %arg5: memref<128x128xf32, #tpu.memory_space<vmem>>) attributes {dimension_semantics = [#tpu.dimension_semantics<parallel>, #tpu.dimension_semantics<arbitrary>], iteration_bounds = array<i64: 2, 2>, scalar_prefetch = 0 : i64, scratch_operands = 1 : i64, tpu.core_type = #tpu.core_type<tc>, window_params = [{transform_indices = @transform_0, window_bounds = array<i64: 128, 128>}, {transform_indices = @transform_1, window_bounds = array<i64: 128, 128>}, {transform_indices = @transform_2, window_bounds = array<i64: 128, 128>}]} {
    %c0_i32 = arith.constant 0 : i32
    %0 = arith.cmpi eq, %arg1, %c0_i32 : i32
    %1 = arith.extui %0 : i1 to i32
    %c0_i32_0 = arith.constant 0 : i32
    %2 = arith.cmpi ne, %1, %c0_i32_0 : i32
    scf.if %2 {
      %cst_9 = arith.constant 0.000000e+00 : f32
      %13 = vector.broadcast %cst_9 : f32 to vector<128x128xf32>
      %c0_10 = arith.constant 0 : index
      %c0_11 = arith.constant 0 : index
      %14 = vector.load %arg5[%c0_10, %c0_11] : memref<128x128xf32, #tpu.memory_space<vmem>>, vector<128x128xf32>
      tpu.vector_store %arg5[%c0_10, %c0_11], %13 {strides = array<i32>} : memref<128x128xf32, #tpu.memory_space<vmem>>, vector<128x128xf32>,
    } else {
    }
    %c0 = arith.constant 0 : index
    %c0_1 = arith.constant 0 : index
    %3 = vector.load %arg2[%c0, %c0_1] : memref<128x128xf32, #tpu.memory_space<vmem>>, vector<128x128xf32>
    %4 = arith.truncf %3 : vector<128x128xf32> to vector<128x128xbf16>
    %c0_2 = arith.constant 0 : index
    %c0_3 = arith.constant 0 : index
    %5 = vector.load %arg5[%c0_2, %c0_3] : memref<128x128xf32, #tpu.memory_space<vmem>>, vector<128x128xf32>
    %c0_4 = arith.constant 0 : index
    %c0_5 = arith.constant 0 : index
    %6 = vector.load %arg3[%c0_4, %c0_5] : memref<128x128xbf16, #tpu.memory_space<vmem>>, vector<128x128xbf16>
    %cst = arith.constant dense<0.000000e+00> : vector<128x128xf32>
    %7 = tpu.matmul %4, %6, %cst {dimension_numbers = #tpu.dot_dimension_numbers<[1], [0], [0], [1], [0, 0, 1, 1], [], []>} : vector<128x128xbf16>, vector<128x128xbf16>, vector<128x128xf32> -> vector<128x128xf32>
    %8 = arith.addf %5, %7 : vector<128x128xf32>
    %c0_6 = arith.constant 0 : index
    %c0_7 = arith.constant 0 : index
    %9 = vector.load %arg5[%c0_6, %c0_7] : memref<128x128xf32, #tpu.memory_space<vmem>>, vector<128x128xf32>
    tpu.vector_store %arg5[%c0_6, %c0_7], %8 {strides = array<i32>} : memref<128x128xf32, #tpu.memory_space<vmem>>, vector<128x128xf32>,
    %c1_i32 = arith.constant 1 : i32
    %10 = arith.cmpi eq, %arg1, %c1_i32 : i32
    %11 = arith.extui %10 : i1 to i32
    %c0_i32_8 = arith.constant 0 : i32
    %12 = arith.cmpi ne, %11, %c0_i32_8 : i32
    scf.if %12 {
      %c0_9 = arith.constant 0 : index
      %c0_10 = arith.constant 0 : index
      %13 = vector.load %arg5[%c0_9, %c0_10] : memref<128x128xf32, #tpu.memory_space<vmem>>, vector<128x128xf32>
      %cst_11 = arith.constant 0.000000e+00 : f32
      %14 = vector.broadcast %cst_11 : f32 to vector<128x128xf32>
      %15 = arith.maximumf %13, %14 : vector<128x128xf32>
      %c0_12 = arith.constant 0 : index
      %c0_13 = arith.constant 0 : index
      %16 = vector.load %arg4[%c0_12, %c0_13] : memref<128x128xf32, #tpu.memory_space<vmem>>, vector<128x128xf32>
      tpu.vector_store %arg4[%c0_12, %c0_13], %15 {strides = array<i32>} : memref<128x128xf32, #tpu.memory_space<vmem>>, vector<128x128xf32>,
    } else {
    }
    return
  }
  func.func @transform_0(%arg0: i32, %arg1: i32) -> (i32, i32) {
    %c0_i32 = arith.constant 0 : i32
    return %arg0, %arg1 : i32, i32
  }
  func.func @transform_1(%arg0: i32, %arg1: i32) -> (i32, i32) {
    %c0_i32 = arith.constant 0 : i32
    %c0_i32_0 = arith.constant 0 : i32
    return %arg1, %c0_i32 : i32, i32
  }
  func.func @transform_2(%arg0: i32, %arg1: i32) -> (i32, i32) {
    %c0_i32 = arith.constant 0 : i32
    %c0_i32_0 = arith.constant 0 : i32
    return %arg0, %c0_i32 : i32, i32
  }
}

</mosaic_0001>

<bundles_post_ra>
// kernel: tpu_custom_call.1
= control target key start
LH: loop header
LB: loop body
LE: loop exit
PB: predicated region body
PF: predicated region fallthrough
CT: control target
= control target key end

     0   :  { %s1373_s0 = inlined_call_operand.hbm [shape: f32[256,256], index: 0, kind: input, shape index: {}]   ;;  %s1374_s1 = inlined_call_operand.hbm [shape: bf16[256,128], index: 1, kind: input, shape index: {}]   ;;  %s1375_s2 = inlined_call_operand.hbm [shape: f32[256,128], index: 2, kind: output, shape index: {}]  }
   0x1   :  { %1382 = sst [smem:[#allocation18_spill]] %s1373_s0 }
   0x2   :  { %1383 = sst [smem:[#allocation19_spill]] %s1374_s1 }
   0x3   :  { %1384 = sst [smem:[#allocation20_spill]] %s1375_s2 }
   0x4   :  { %7 = vsyncpa [#allocation4], 0 }
   0x5   :  { %9 = vsyncpa [#allocation4 + $0x1], 0 }
   0x6   :  { %10 = vsyncpa [#allocation7], 0 }
   0x7   :  { %12 = vsyncpa [#allocation7 + $0x1], 0 }
   0x8   :  { %13 = vsyncpa [#allocation5], 0 }
   0x9   :  { %15 = vsyncpa [#allocation5 + $0x1], 0  ;;  %s1070_s9 = smov 0   ;;  %s1072_s10 = smov 0  }
   0xa   :  { %s1074_s11 = smov 0   ;;  %s1076_s12 = smov 0  }
   0xb   :  { %s1078_s13 = smov 0   ;;  %s1080_s14 = smov 0  }
   0xc   :  { %s1082_s15 = smov 0   ;;  %s1084_s16 = smov 0  }
   0xd   :  { %s1086_s17 = smov 0   ;;  %s1088_s18 = smov 0  }
   0xe   :  { %s1090_s19 = smov 0   ;;  %s1092_s20 = smov 0  }
   0xf   :  { %s1094_s21 = smov 0   ;;  %s1096_s22 = smov 0  }
  0x10 LB: > { %1385 = sst [smem:[#allocation12_spill]] %s1029_s18  ;;  %s30_s23 = sadd.s32 1, %s1037_s20  ;;  %s1045_s22 = sphi %s1096_s22, %s21_s22   ;;  %s1041_s21 = sphi %s1094_s21, %s1409_s21   ;;  %s1037_s20 = sphi %s1092_s20, %s1408_s20   ;;  %s1033_s19 = sphi %s1090_s19, %s1407_s19   ;;  %s1029_s18 = sphi %s1088_s18, %s1406_s18   ;;  %s1025_s17 = sphi %s1086_s17, %s1418_s17   ;;  %s1021_s16 = sphi %s1084_s16, %s1417_s16   ;;  %s1017_s15 = sphi %s1082_s15, %s1416_s15   ;;  %s1013_s14 = sphi %s1080_s14, %s1415_s14   ;;  %s1009_s13 = sphi %s1078_s13, %s1414_s13   ;;  %s1005_s12 = sphi %s1076_s12, %s1413_s12   ;;  %s1001_s11 = sphi %s1074_s11, %s1412_s11   ;;  %s997_s10 = sphi %s1072_s10, %s1411_s10   ;;  %s993_s9 = sphi %s1070_s9, %s1410_s9  }
  0x11   : > { %1386 = sst [smem:[#allocation13_spill]] %s1033_s19  ;;  %s33_s24 = sadd.s32 1, %s1041_s21 }
  0x12   : > { %1387 = sst [smem:[#allocation14_spill]] %s1037_s20  ;;  %p31_p0 = scmp.ge.s32.totalorder %s30_s23, 2 }
  0x13   : > { %1388 = sst [smem:[#allocation15_spill]] %s1041_s21  ;;  %s42_s25 = sadd.s32 1, %s1025_s17 }
  0x14   : > { %p49_p1 = scmp.ne.s32.totalorder %s1025_s17, %s1021_s16  ;;  %p50_p2 = scmp.eq.s32.totalorder %s1045_s22, 0 }
  0x15   : > { %s1420_s23 = smov (%p31_p0, %s30_s23), 0  ;;  %s1422_s24 = smov (!%p31_p0, %s33_s24), %s1041_s21 }
  0x16   : > { %1389 = sst [smem:[#allocation16_spill]] %s1420_s23  ;;  %s1151_s26 = ssub.s32 %s1037_s20, %s1420_s23 }
  0x17   : > { %p1155_p3 = por %p50_p2, %p49_p1  ;;  %p35_p4 = scmp.ge.s32.totalorder %s1422_s24, 2 }
  0x18   : > { %p55_p5 = scmp.ne.s32.totalorder %s1021_s16, %s1017_s15  ;;  %p66_p6 = scmp.eq.s32.totalorder %s1151_s26, 0 }
  0x19   : > { %s94_s28 = sadd.s32 1, %s1001_s11  ;;  %s1424_s24 = smov (%p35_p4, %s1422_s24), 0 }
  0x1a   : > { %1391 = sst [smem:[#allocation17_spill]] %s1424_s24  ;;  %p1379_p7 = scmp.lt.s32.totalorder %s1045_s22, 4 }
  0x1b   : > { %s37_s29 = ssub.s32 %s1041_s21, %s1424_s24  ;;  %s131_s30 = sand.u32 1, %s1025_s17  }
  0x1c   : > { %s39_s3 = sor.u32 %s1151_s26, %s37_s29  ;;  %p92_p8 = scmp.eq.s32.totalorder %s37_s29, 0 }
  0x1d   : > { %p40_p9 = scmp.eq.s32.totalorder %s39_s3, 0  ;;  %s611_s6 = sshll.u32 %s131_s30, 7 }
  0x1e   : > { %s1171_s4 = scalar_select %p92_p8, %s1001_s11, %s94_s28  }
  0x1f   : > { %s1174_s5 = scalar_select %p40_p9, %s1025_s17, %s42_s25  }
  0x20   : > { %s661_s7 = sshll.u32 %s1041_s21, 5  ;;  %s135_s2 = scalar_lea.vmem [#allocation3], %s611_s6 }
  0x21   : > { %s140_s8 = sadd.s32 %s1037_s20, %s661_s7  ;;  %s145_s24 = sshll.u32 %s135_s2, 4  ;;  %s146_s24 = int_to_ptr.vmem [resolvable:$true] %s145_s24 }
  0x22   : > { %s614_s23 = sshll.u32 %s140_s8, 3  ;;  %s1392_s0 = sld [smem:[#allocation18_spill]] }
  0x23   : > { %p703_p10 = pnand %p1379_p7, %p1155_p3  ;;  %p618_p11 = scmp.ge.s32.totalorder %s1045_s22, 1 }
  0x24   : > { %s132_s2 = scalar_lea.sflag [#allocation4], %s131_s30  ;;  %s1047_s18 = smov 256  }
  0x25   : > { %s1048_s19 = smov 128   ;;  %p175_p12 = scmp.lt.s32.totalorder %s1045_s22, 5 }
  0x26   : > { %s607_s25 = sadd.s32 4294967295, %s1045_s22   ;;  %s608_s27 = sadd.s32 4294967294, %s1045_s22  }
  0x27   : > { %p1187_p13 = pnand %p618_p11, %p175_p12  ;;  %p56_p0 = scmp.eq.s32.totalorder %s607_s25, 0 }
  0x28   : > { %s142_s1 = scalar_lea.hbm %s1392_s0, %s614_s23  ;;  %s1049_s23 = smov 8  }
  0x29   : > { %s143_s28 = sshll.u32 %s142_s1, 4  ;;  %s68_s29 = sadd.s32 1, %s1013_s14  ;;  %s144_s28 = int_to_ptr.hbm [resolvable:$true] %s143_s28 }
  0x2a   : > { %705 = dma.hbm_to_vmem [thread:$0]  (!%p703_p10), %s144_s28, 2048, %s146_s24, %s132_s2, %s1047_s18, %s1048_s19, %s1049_s23  }
  0x2b   : > { %s1197_s30 = scalar_select %p66_p6, %s1013_s14, %s68_s29  }
  0x2c   : > { %p1202_p1 = por %p56_p0, %p55_p5  ;;  %p75_p3 = scmp.ne.s32.totalorder %s1013_s14, %s1009_s13 }
  0x2d   : > { %p81_p4 = scmp.ne.s32.totalorder %s1009_s13, %s1005_s12  ;;  %p104_p8 = scmp.ne.s32.totalorder %s1001_s11, %s997_s10 }
  0x2e   : > { %p1214_p9 = por %p75_p3, %p50_p2  ;;  %p105_p10 = scmp.eq.s32.totalorder %s607_s25, 3 }
  0x2f   : > { %p1218_p11 = por %p81_p4, %p56_p0  ;;  %p110_p6 = scmp.ne.s32.totalorder %s997_s10, %s993_s9 }
  0x30   : > { %p1224_p5 = por %p105_p10, %p104_p8  ;;  %p111_p12 = scmp.eq.s32.totalorder %s608_s27, 3 }
  0x31   : > { %s155_s12 = sand.u32 1, %s1013_s14   ;;  %s662_s6 = sshll.u32 %s1037_s20, 6 }
  0x32   : > { %p1230_p7 = por %p111_p12, %p110_p6  ;;  %s615_s8 = sshll.u32 %s155_s12, 6 }
  0x33   : > { %s1399_s18 = sld [smem:[#allocation19_spill]]  ;;  %s159_s25 = scalar_lea.vmem [#allocation6], %s615_s8 }
  0x34   : > { %s167_s29 = sshll.u32 %s159_s25, 4  ;;  %p1400_p2 = scmp.lt.s32.totalorder %s1045_s22, 4  ;;  %s168_s29 = int_to_ptr.vmem [resolvable:$true] %s167_s29 }
  0x35   : > { %s156_s27 = scalar_lea.sflag [#allocation7], %s155_s12  ;;  %s1050_s0 = smov 64  }
  0x36   : > { %p706_p0 = pnand %p1400_p2, %p1214_p9  ;;  %s1051_s21 = smov 4  }
  0x37   : > { %179 = sbr.rel (%p1187_p13) target bundleno = 329 (0x149), region = 28  ;;  %s181_s20 = sand.u32 (!%p1187_p13), 1, %s1021_s16  }
  0x38   : > { %s619_s28 = sshll.u32 (!%p1187_p13), %s181_s20, 7 }
  0x39   : > { %s164_s19 = scalar_lea.hbm %s1399_s18, %s662_s6  ;;  %s182_s6 = scalar_lea.sflag (!%p1187_p13), [#allocation4], %s181_s20 }
  0x3a   : > { %s165_s23 = sshll.u32 %s164_s19, 4  ;;  %s1244_s2 = scalar_lea.vmem (!%p1187_p13), [#allocation3], %s619_s28  ;;  %s166_s23 = int_to_ptr.hbm [resolvable:$true] %s165_s23 }
  0x3b   : > { %708 = dma.hbm_to_vmem [thread:$0]  (!%p706_p0), %s166_s23, 1024, %s168_s29, %s156_s27, %s1050_s0, %s1050_s0, %s1051_s21  }
  0x3c   : > { %980 = dma.done.wait (%p1202_p1), %s182_s6, 2048  }
  0x3d   : > { %982 = vsyncadd (%p1202_p1), %s182_s6, 4294965248  ;;  %s191_s24 = sand.u32 1, %s1009_s13  }
  0x3e   : > { %s620_s12 = sshll.u32 %s191_s24, 6  ;;  %s192_s0 = scalar_lea.sflag [#allocation7], %s191_s24 }
  0x3f   : > { %s1251_s21 = scalar_lea.vmem [#allocation6], %s620_s12 }
  0x40   : > { %984 = dma.done.wait (%p1218_p11), %s192_s0, 1024  }
  0x41   : > { %986 = vsyncadd (%p1218_p11), %s192_s0, 4294966272  ;;  %s219_s20 = sand.u32 1, %s997_s10   ;;  %s1401_s3 = sld [smem:[#allocation12_spill]] }
  0x42   : > { %s621_s1 = sshll.u32 %s219_s20, 7 }
  0x43   : > { %s1260_s8 = scalar_lea.vmem [#allocation8], %s621_s1 }
  0x47   : > { %p622_p13 = scmp.ne.s32.totalorder %s1401_s3, 0 }
  0x49   : > { %228 = sbr.rel (%p622_p13) target bundleno = 95 (0x5f), region = 40 }
  0x4e   : > { %v1052_v0 = vmov 0.0  }
  0x4f   : > { %229 = vst [vmem:[#allocation2 + $0x30] sm:$0xff] %v1052_v0 }
  0x50   : > { %230 = vst [vmem:[#allocation2] sm:$0xff] %v1052_v0 }
  0x51   : > { %231 = vst [vmem:[#allocation2 + $0x58] sm:$0xff] %v1052_v0 }
  0x52   : > { %232 = vst [vmem:[#allocation2 + $0x18] sm:$0xff] %v1052_v0 }
  0x53   : > { %233 = vst [vmem:[#allocation2 + $0x50] sm:$0xff] %v1052_v0 }
  0x54   : > { %234 = vst [vmem:[#allocation2 + $0x68] sm:$0xff] %v1052_v0 }
  0x55   : > { %235 = vst [vmem:[#allocation2 + $0x8] sm:$0xff] %v1052_v0 }
  0x56   : > { %236 = vst [vmem:[#allocation2 + $0x48] sm:$0xff] %v1052_v0 }
  0x57   : > { %237 = vst [vmem:[#allocation2 + $0x40] sm:$0xff] %v1052_v0 }
  0x58   : > { %238 = vst [vmem:[#allocation2 + $0x20] sm:$0xff] %v1052_v0 }
  0x59   : > { %239 = vst [vmem:[#allocation2 + $0x10] sm:$0xff] %v1052_v0 }
  0x5a   : > { %240 = vst [vmem:[#allocation2 + $0x38] sm:$0xff] %v1052_v0 }
  0x5b   : > { %241 = vst [vmem:[#allocation2 + $0x60] sm:$0xff] %v1052_v0 }
  0x5c   : > { %242 = vst [vmem:[#allocation2 + $0x70] sm:$0xff] %v1052_v0 }
  0x5d   : > { %243 = vst [vmem:[#allocation2 + $0x78] sm:$0xff] %v1052_v0 }
  0x5e   : > { %244 = vst [vmem:[#allocation2 + $0x28] sm:$0xff] %v1052_v0 }
  0x5f PF: > { %v670_v1 = vld [vmem:[%s1251_s21 + $0x38] sm:$0xff]  ;;  %v669_v2 = vld [vmem:[%s1251_s21 + $0x30] sm:$0xff]  ;;  %v668_v3 = vld [vmem:[%s1251_s21 + $0x28] sm:$0xff]  ;;  %s1402_s26 = sld [smem:[#allocation12_spill]] }
  0x60   : > { %349 = vmatpush.bf16.msra.mxu0 %v670_v1  ;;  %672 = vmatpush.bf16.msra.mxu1 %v670_v1  ;;  %v667_v4 = vld [vmem:[%s1251_s21 + $0x20] sm:$0xff]  ;;  %v666_v5 = vld [vmem:[%s1251_s21 + $0x18] sm:$0xff]  ;;  %v665_v6 = vld [vmem:[%s1251_s21 + $0x10] sm:$0xff] }
  0x61   : > { %673 = vmatpush.bf16.msra.mxu2 %v670_v1  ;;  %674 = vmatpush.bf16.msra.mxu3 %v670_v1  ;;  %v664_v7 = vld [vmem:[%s1251_s21 + $0x8] sm:$0xff]  ;;  %v663_v8 = vld [vmem:[%s1251_s21] sm:$0xff]  ;;  %v247_v21 = vld [vmem:[%s1244_s2 + $0x10] sm:$0xff] }
  0x62   : > { %v245_v9 = vld [vmem:[%s1244_s2] sm:$0xff]  ;;  %v246_v10 = vld [vmem:[%s1244_s2 + $0x8] sm:$0xff]  ;;  %v248_v22 = vld [vmem:[%s1244_s2 + $0x18] sm:$0xff] }
  0x63   : > { %v249_v11 = vld [vmem:[%s1244_s2 + $0x20] sm:$0xff]  ;;  %v250_v12 = vld [vmem:[%s1244_s2 + $0x28] sm:$0xff]  ;;  %v261_v17 = vpack.c.bf16 %v246_v10, %v245_v9  ;;  %v251_v23 = vld [vmem:[%s1244_s2 + $0x30] sm:$0xff]  ;;  %v262_v29 = vpack.c.bf16 %v248_v22, %v247_v21 }
  0x64   : > { %350 = vmatpush.bf16.msra.mxu0 %v669_v2  ;;  %675 = vmatpush.bf16.msra.mxu1 %v669_v2  ;;  %v253_v13 = vld [vmem:[%s1244_s2 + $0x40] sm:$0xff]  ;;  %v254_v14 = vld [vmem:[%s1244_s2 + $0x48] sm:$0xff]  ;;  %v263_v18 = vpack.c.bf16 %v250_v12, %v249_v11  ;;  %v252_v24 = vld [vmem:[%s1244_s2 + $0x38] sm:$0xff] }
  0x65   : > { %676 = vmatpush.bf16.msra.mxu2 %v669_v2  ;;  %677 = vmatpush.bf16.msra.mxu3 %v669_v2  ;;  %v257_v15 = vld [vmem:[%s1244_s2 + $0x60] sm:$0xff]  ;;  %v258_v16 = vld [vmem:[%s1244_s2 + $0x68] sm:$0xff]  ;;  %v265_v19 = vpack.c.bf16 %v254_v14, %v253_v13  ;;  %v255_v25 = vld [vmem:[%s1244_s2 + $0x50] sm:$0xff]  ;;  %v264_v30 = vpack.c.bf16 %v252_v24, %v251_v23  ;;  %p655_p1 = scmp.ne.s32.totalorder %s1402_s26, 1 }
  0x66   : > { %v267_v20 = vpack.c.bf16 %v258_v16, %v257_v15  ;;  %v256_v26 = vld [vmem:[%s1244_s2 + $0x58] sm:$0xff]  ;;  %v259_v27 = vld [vmem:[%s1244_s2 + $0x70] sm:$0xff]  ;;  %v277_v39 = vld [vmem:[#allocation2 + $0x40] sm:$0xff] }
  0x67   : > { %v260_v28 = vld [vmem:[%s1244_s2 + $0x78] sm:$0xff]  ;;  %v266_v31 = vpack.c.bf16 %v256_v26, %v255_v25  ;;  %v269_v33 = vld [vmem:[#allocation2 + $0x30] sm:$0xff]  ;;  %v281_v40 = vld [vmem:[#allocation2 + $0x60] sm:$0xff] }
  0x68   : > { %351 = vmatpush.bf16.msra.mxu0 %v668_v3  ;;  %678 = vmatpush.bf16.msra.mxu1 %v668_v3  ;;  %v268_v32 = vpack.c.bf16 %v260_v28, %v259_v27  ;;  %v273_v34 = vld [vmem:[#allocation2 + $0x50] sm:$0xff]  ;;  %v270_v41 = vld [vmem:[#allocation2] sm:$0xff]  ;;  %v274_v42 = vld [vmem:[#allocation2 + $0x68] sm:$0xff] }
  0x69   : > { %679 = vmatpush.bf16.msra.mxu2 %v668_v3  ;;  %680 = vmatpush.bf16.msra.mxu3 %v668_v3  ;;  %v278_v51 = vld [vmem:[#allocation2 + $0x20] sm:$0xff]  ;;  %v282_v52 = vld [vmem:[#allocation2 + $0x70] sm:$0xff]  ;;  %v271_v53 = vld [vmem:[#allocation2 + $0x58] sm:$0xff] }
  0x6a   : > { %v275_v54 = vld [vmem:[#allocation2 + $0x8] sm:$0xff]  ;;  %v279_v63 = vld [vmem:[#allocation2 + $0x10] sm:$0xff]  ;;  %v283_v0 = vld [vmem:[#allocation2 + $0x78] sm:$0xff] }
  0x6b   : > { %v272_v1 = vld [vmem:[#allocation2 + $0x18] sm:$0xff]  ;;  %v276_v2 = vld [vmem:[#allocation2 + $0x48] sm:$0xff] }
  0x6c   : > { %352 = vmatpush.bf16.msra.mxu0 %v667_v4  ;;  %681 = vmatpush.bf16.msra.mxu1 %v667_v4  ;;  %v280_v11 = vld [vmem:[#allocation2 + $0x38] sm:$0xff]  ;;  %v284_v12 = vld [vmem:[#allocation2 + $0x28] sm:$0xff] }
  0x6d   : > { %682 = vmatpush.bf16.msra.mxu2 %v667_v4  ;;  %683 = vmatpush.bf16.msra.mxu3 %v667_v4 }
  0x70   : > { %353 = vmatpush.bf16.msra.mxu0 %v666_v5  ;;  %684 = vmatpush.bf16.msra.mxu1 %v666_v5 }
  0x71   : > { %685 = vmatpush.bf16.msra.mxu2 %v666_v5  ;;  %686 = vmatpush.bf16.msra.mxu3 %v666_v5 }
  0x74   : > { %354 = vmatpush.bf16.msra.mxu0 %v665_v6  ;;  %687 = vmatpush.bf16.msra.mxu1 %v665_v6 }
  0x75   : > { %688 = vmatpush.bf16.msra.mxu2 %v665_v6  ;;  %689 = vmatpush.bf16.msra.mxu3 %v665_v6 }
  0x78   : > { %355 = vmatpush.bf16.msra.mxu0 %v664_v7  ;;  %690 = vmatpush.bf16.msra.mxu1 %v664_v7 }
  0x79   : > { %691 = vmatpush.bf16.msra.mxu2 %v664_v7  ;;  %692 = vmatpush.bf16.msra.mxu3 %v664_v7 }
  0x7c   : > { %356 = vmatpush.bf16.msra.mxu0 %v663_v8  ;;  %693 = vmatpush.bf16.msra.mxu1 %v663_v8 }
  0x7d   : > { %694 = vmatpush.bf16.msra.mxu2 %v663_v8  ;;  %695 = vmatpush.bf16.msra.mxu3 %v663_v8 }
  0x7f   : > { %357 = vmatmul.bf16.vlgmr.msra.gmra.mxu0 %v261_v17  ;;  %367 = vmatmul.bf16.vlgmr.msra.gmra.mxu1 %v263_v18 }
  0x80   : > { %377 = vmatmul.bf16.vlgmr.msra.gmra.mxu2 %v265_v19  ;;  %387 = vmatmul.bf16.vlgmr.msra.gmra.mxu3 %v267_v20 }
  0x8f   : > { %362 = vmatmul.bf16.gmra.mxu0 %v262_v29  ;;  %372 = vmatmul.bf16.gmra.mxu1 %v264_v30 }
  0x90   : > { %382 = vmatmul.bf16.gmra.mxu2 %v266_v31  ;;  %392 = vmatmul.bf16.gmra.mxu3 %v268_v32 }
  0xfc   : > { %v358_v35 = vpop.f32.mrf.mxu0  ;;  %v368_v36 = vpop.f32.mrf.mxu1 }
  0xfd   : > { %v398_v37 = vadd.f32 %v358_v35, %v269_v33  ;;  %v402_v38 = vadd.f32 %v368_v36, %v273_v34 }
  0xff   : > { %414 = vst [vmem:[#allocation2 + $0x30] sm:$0xff] %v398_v37 }
 0x100   : > { %418 = vst [vmem:[#allocation2 + $0x50] sm:$0xff] %v402_v38 }
 0x103   : > { %v378_v43 = vpop.f32.mrf.mxu2  ;;  %v388_v44 = vpop.f32.mrf.mxu3 }
 0x104   : > { %v406_v45 = vadd.f32 %v378_v43, %v277_v39  ;;  %v410_v46 = vadd.f32 %v388_v44, %v281_v40  ;;  %v360_v47 = vpop.f32.mrf.mxu0  ;;  %v370_v48 = vpop.f32.mrf.mxu1 }
 0x105   : > { %v399_v49 = vadd.f32 %v360_v47, %v270_v41  ;;  %v403_v50 = vadd.f32 %v370_v48, %v274_v42 }
 0x106   : > { %422 = vst [vmem:[#allocation2 + $0x40] sm:$0xff] %v406_v45 }
 0x107   : > { %426 = vst [vmem:[#allocation2 + $0x60] sm:$0xff] %v410_v46 }
 0x108   : > { %415 = vst [vmem:[#allocation2] sm:$0xff] %v399_v49 }
 0x109   : > { %419 = vst [vmem:[#allocation2 + $0x68] sm:$0xff] %v403_v50 }
 0x10b   : > { %v380_v55 = vpop.f32.mrf.mxu2  ;;  %v390_v56 = vpop.f32.mrf.mxu3 }
 0x10c   : > { %v407_v57 = vadd.f32 %v380_v55, %v278_v51  ;;  %v411_v58 = vadd.f32 %v390_v56, %v282_v52  ;;  %v363_v59 = vpop.f32.mrf.mxu0  ;;  %v373_v60 = vpop.f32.mrf.mxu1 }
 0x10d   : > { %v400_v61 = vadd.f32 %v363_v59, %v271_v53  ;;  %v404_v62 = vadd.f32 %v373_v60, %v275_v54 }
 0x10e   : > { %423 = vst [vmem:[#allocation2 + $0x20] sm:$0xff] %v407_v57 }
 0x10f   : > { %427 = vst [vmem:[#allocation2 + $0x70] sm:$0xff] %v411_v58 }
 0x110   : > { %416 = vst [vmem:[#allocation2 + $0x58] sm:$0xff] %v400_v61 }
 0x111   : > { %420 = vst [vmem:[#allocation2 + $0x8] sm:$0xff] %v404_v62 }
 0x113   : > { %v383_v3 = vpop.f32.mrf.mxu2  ;;  %v393_v4 = vpop.f32.mrf.mxu3 }
 0x114   : > { %v408_v5 = vadd.f32 %v383_v3, %v279_v63  ;;  %v412_v6 = vadd.f32 %v393_v4, %v283_v0  ;;  %v365_v7 = vpop.f32.mrf.mxu0  ;;  %v375_v8 = vpop.f32.mrf.mxu1 }
 0x115   : > { %v401_v9 = vadd.f32 %v365_v7, %v272_v1  ;;  %v405_v10 = vadd.f32 %v375_v8, %v276_v2 }
 0x116   : > { %424 = vst [vmem:[#allocation2 + $0x10] sm:$0xff] %v408_v5 }
 0x117   : > { %428 = vst [vmem:[#allocation2 + $0x78] sm:$0xff] %v412_v6 }
 0x118   : > { %417 = vst [vmem:[#allocation2 + $0x18] sm:$0xff] %v401_v9 }
 0x119   : > { %421 = vst [vmem:[#allocation2 + $0x48] sm:$0xff] %v405_v10 }
 0x11b   : > { %v385_v13 = vpop.f32.mrf.mxu2  ;;  %v395_v14 = vpop.f32.mrf.mxu3  ;;  %433 = sbr.rel (%p655_p1) target bundleno = 307 (0x133), region = 44 }
 0x11c   : > { %v409_v15 = vadd.f32 %v385_v13, %v280_v11  ;;  %v413_v16 = vadd.f32 %v395_v14, %v284_v12 }
 0x11e   : > { %425 = vst [vmem:[#allocation2 + $0x38] sm:$0xff] %v409_v15 }
 0x11f   : > { %429 = vst [vmem:[#allocation2 + $0x28] sm:$0xff] %v413_v16 }
 0x120   : > { %v434_v17 = vld [vmem:[#allocation2 + $0x30] sm:$0xff]  ;;  %v435_v18 = vld [vmem:[#allocation2] sm:$0xff]  ;;  %v436_v19 = vld [vmem:[#allocation2 + $0x58] sm:$0xff] }
 0x121   : > { %v450_v20 = vmax.f32 %v434_v17, 0.0  ;;  %v451_v21 = vmax.f32 %v435_v18, 0.0  ;;  %v452_v22 = vmax.f32 %v436_v19, 0.0  ;;  %v437_v23 = vld [vmem:[#allocation2 + $0x18] sm:$0xff]  ;;  %v438_v24 = vld [vmem:[#allocation2 + $0x50] sm:$0xff]  ;;  %v439_v25 = vld [vmem:[#allocation2 + $0x68] sm:$0xff] }
 0x122   : > { %v453_v26 = vmax.f32 %v437_v23, 0.0  ;;  %v440_v27 = vld [vmem:[#allocation2 + $0x8] sm:$0xff]  ;;  %v454_v28 = vmax.f32 %v438_v24, 0.0  ;;  %v455_v30 = vmax.f32 %v439_v25, 0.0  ;;  %v442_v31 = vld [vmem:[#allocation2 + $0x40] sm:$0xff]  ;;  %v444_v35 = vld [vmem:[#allocation2 + $0x10] sm:$0xff] }
 0x123   : > { %466 = vst [vmem:[%s1260_s8] sm:$0xff] %v450_v20  ;;  %v441_v29 = vld [vmem:[#allocation2 + $0x48] sm:$0xff]  ;;  %v456_v32 = vmax.f32 %v440_v27, 0.0  ;;  %v443_v33 = vld [vmem:[#allocation2 + $0x20] sm:$0xff]  ;;  %v458_v36 = vmax.f32 %v442_v31, 0.0  ;;  %v460_v40 = vmax.f32 %v444_v35, 0.0  ;;  %v447_v41 = vld [vmem:[#allocation2 + $0x70] sm:$0xff] }
 0x124   : > { %467 = vst [vmem:[%s1260_s8 + $0x8] sm:$0xff] %v451_v21  ;;  %v457_v34 = vmax.f32 %v441_v29, 0.0  ;;  %v459_v38 = vmax.f32 %v443_v33, 0.0  ;;  %v446_v39 = vld [vmem:[#allocation2 + $0x60] sm:$0xff]  ;;  %v448_v43 = vld [vmem:[#allocation2 + $0x78] sm:$0xff]  ;;  %v463_v46 = vmax.f32 %v447_v41, 0.0 }
 0x125   : > { %468 = vst [vmem:[%s1260_s8 + $0x10] sm:$0xff] %v452_v22  ;;  %v445_v37 = vld [vmem:[#allocation2 + $0x38] sm:$0xff]  ;;  %v462_v44 = vmax.f32 %v446_v39, 0.0  ;;  %v464_v47 = vmax.f32 %v448_v43, 0.0 }
 0x126   : > { %469 = vst [vmem:[%s1260_s8 + $0x18] sm:$0xff] %v453_v26  ;;  %v461_v42 = vmax.f32 %v445_v37, 0.0  ;;  %v449_v45 = vld [vmem:[#allocation2 + $0x28] sm:$0xff] }
 0x127   : > { %470 = vst [vmem:[%s1260_s8 + $0x20] sm:$0xff] %v454_v28  ;;  %v465_v48 = vmax.f32 %v449_v45, 0.0 }
 0x128   : > { %471 = vst [vmem:[%s1260_s8 + $0x28] sm:$0xff] %v455_v30 }
 0x129   : > { %472 = vst [vmem:[%s1260_s8 + $0x30] sm:$0xff] %v456_v32 }
 0x12a   : > { %473 = vst [vmem:[%s1260_s8 + $0x38] sm:$0xff] %v457_v34 }
 0x12b   : > { %474 = vst [vmem:[%s1260_s8 + $0x40] sm:$0xff] %v458_v36 }
 0x12c   : > { %475 = vst [vmem:[%s1260_s8 + $0x48] sm:$0xff] %v459_v38 }
 0x12d   : > { %476 = vst [vmem:[%s1260_s8 + $0x50] sm:$0xff] %v460_v40 }
 0x12e   : > { %477 = vst [vmem:[%s1260_s8 + $0x58] sm:$0xff] %v461_v42 }
 0x12f   : > { %478 = vst [vmem:[%s1260_s8 + $0x60] sm:$0xff] %v462_v44 }
 0x130   : > { %479 = vst [vmem:[%s1260_s8 + $0x68] sm:$0xff] %v463_v46 }
 0x131   : > { %480 = vst [vmem:[%s1260_s8 + $0x70] sm:$0xff] %v464_v47 }
 0x132   : > { %481 = vst [vmem:[%s1260_s8 + $0x78] sm:$0xff] %v465_v48 }
 0x133 PF: > { %s1403_s18 = sld [smem:[#allocation13_spill]]  ;;  %s495_s28 = sshll.u32 %s1260_s8, 4  ;;  %s496_s28 = int_to_ptr.vmem [resolvable:$true] %s495_s28 }
 0x134   : > { %s1404_s29 = sld [smem:[#allocation20_spill]]  ;;  %s483_s2 = scalar_lea.sflag [#allocation5], %s219_s20 }
 0x139   : > { %s671_s19 = sshll.u32 %s1403_s18, 7 }
 0x13a   : > { %s494_s27 = scalar_lea.hbm %s1404_s29, %s671_s19  ;;  %s915_s1 = scalar_lea.hbm %s1404_s29, 256 }
 0x13b   : > { %s497_s6 = sshll.u32 %s494_s27, 4  ;;  %s498_s6 = int_to_ptr.hbm [resolvable:$true] %s497_s6 }
 0x13c   : > { %s909_s24 = sshra.s32 %s498_s6, 4  ;;  %s910_s24 = int_to_ptr.hbm [resolvable:$true] %s909_s24 }
 0x13d   : > { %s911_s12 = scalar_lea.hbm %s910_s24, 128  ;;  %p916_p9 = scmp.lt.s32.totalorder %s910_s24, %s1404_s29 }
 0x13e   : > { %p912_p3 = scmp.ne.s32.totalorder %s910_s24, %s911_s12  ;;  %p917_p10 = scmp.lt.s32.totalorder %s915_s1, %s911_s12 }
 0x140   : > { %p913_p4 = pnand %p912_p3, %p1224_p5  ;;  %p918_p11 = por %p917_p10, %p916_p9 }
 0x142   : > { %p914_p8 = pneg %p913_p4 }
 0x144   : > { %p919_p6 = pnand %p918_p11, %p914_p8 }
 0x146   : > { %922 = shalt.err (!%p919_p6)
}
 0x147   : > { %s1053_s20 = smov 128   ;;  %s1054_s8 = smov 8  }
 0x148   : > { %700 = dma.vmem_to_hbm [thread:$0]  (%p1224_p5), %s496_s28, 2048, %s498_s6, %s483_s2, %s1053_s20, %s1053_s20, %s1054_s8  }
 0x149 PF: > { %p714_p12 = scmp.ge.s32.totalorder %s1045_s22, 2  ;;  %s512_s18 = sand.u32 1, %s993_s9  }
 0x14a   : > { %s513_s19 = scalar_lea.sflag [#allocation5], %s512_s18 }
 0x14b   : > { %p710_p2 = pnand %p714_p12, %p1230_p7 }
 0x14d   : > { %p711_p0 = pneg %p710_p2 }
 0x14f   : > { %988 = dma.done.wait (%p711_p0), %s513_s19, 2048  }
 0x150   : > { %990 = vsyncadd (%p711_p0), %s513_s19, 4294965248  ;;  %s21_s22 = sadd.s32 1, %s1045_s22   ;;  %s1406_s18 = sld [smem:[#allocation14_spill]] }
 0x151   : > { %p1326_p13 = scmp.ge.s32.totalorder %s21_s22, 6   ;;  %s1407_s19 = sld [smem:[#allocation15_spill]] }
 0x152   : > { %s1408_s20 = sld [smem:[#allocation16_spill]]  ;;  %s1410_s9 = smov %s997_s10 }
 0x153   : > { %s1409_s21 = sld [smem:[#allocation17_spill]]  ;;  %s1411_s10 = smov %s1001_s11 }
 0x154   : > { %s1412_s11 = smov %s1171_s4  ;;  %s1413_s12 = smov %s1009_s13 }
 0x155   : > { %s1414_s13 = smov %s1013_s14  ;;  %s1415_s14 = smov %s1197_s30 }
 0x156   : > { %s1416_s15 = smov %s1021_s16  ;;  %s1417_s16 = smov %s1025_s17 }
 0x157   : > { %s1418_s17 = smov %s1174_s5  ;;  %20 = sbr.rel (!%p1326_p13) target bundleno = 16 (0x10), region = 94 }
 0x15c   :  { %519 = vsyncpa [#allocation4], 1 }
 0x15d   :  { %521 = vsyncpa [#allocation4 + $0x1], 1 }
 0x15e   :  { %522 = vsyncpa [#allocation7], 1 }
 0x15f   :  { %524 = vsyncpa [#allocation7 + $0x1], 1 }
 0x160   :  { %525 = vsyncpa [#allocation5], 1 }
 0x161   :  { %527 = vsyncpa [#allocation5 + $0x1], 1 }

</bundles_post_ra>
